<compile_context>
chip_gen: v7x
topology: tpu7x:2x2x1
jax: 0.10.0
libtpu: 0.0.40
codegen_flags: <defaults>
</compile_context>

<pallas_src>
import functools

import jax
import jax.numpy as jnp
from jax import lax
from jax.experimental import pallas as pl
from jax.experimental.pallas import tpu as pltpu

_LANE = 128          # lane width of one reference chunk (vreg lane count)
_DEFAULT_TNS = 128   # samples (sublanes) per grid step
_NEG_BIG = -1e30     # padding for refer_time (mask stays False); hr padding is 0.0


def _round_up(x, mult):
    return ((x + mult - 1) // mult) * mult


def _neg_log_lik_kernel(pet_ref, hr_ref, rt_ref, out_ref, *, m_rows):
    # pet_ref : (TNS, 3)        columns = [risk, E, time], n on sublanes
    # hr_ref  : (m_rows, 128)   exp(refer_pred[:, 0]), 0.0-padded (VMEM resident)
    # rt_ref  : (m_rows, 128)   refer_time, -1e30-padded          (VMEM resident)
    # out_ref : (TNS, 1)
    tns = pet_ref.shape[0]

    risk = pet_ref[:, 0:1]                                    # (TNS, 1)
    e = pet_ref[:, 1:2]                                       # (TNS, 1)
    # Hoisted lane-broadcast of time (loop-invariant).
    t_b = jnp.broadcast_to(pet_ref[:, 2:3], (tns, _LANE))     # (TNS, 128)

    def body(c, acc):
        rt = rt_ref[pl.ds(c, 1), :]                           # (1, 128)
        hr = hr_ref[pl.ds(c, 1), :]                           # (1, 128)
        # contrib[nn, mm] = hr[mm] if rt[mm] >= time[nn] else 0  -> pure VALU
        return acc + jnp.where(rt >= t_b, hr, 0.0)

    acc0 = jnp.zeros((tns, _LANE), jnp.float32)
    acc = lax.fori_loop(0, m_rows, body, acc0, unroll=(m_rows <= 8))

    # Single cross-lane (XLU) reduction per N tile.
    risk_set_sum = jnp.sum(acc, axis=1, keepdims=True)        # (TNS, 1)
    partial_sum = jnp.exp(risk) + risk_set_sum
    out_ref[...] = -(risk - jnp.log(partial_sum)) * e


def neg_log_likelihood_per_sample_for_splitting(
    prediction, targets, time, refer_prediction, refer_time, *, tns=_DEFAULT_TNS
):
    """prediction: (N, 1), targets: (N, 1), time: (N,),
    refer_prediction: (M, K), refer_time: (M,).  Returns (N,) float32."""
    n = prediction.shape[0]
    m = refer_prediction.shape[0]

    # --- N tiling: n on sublanes; prefer >= 2 blocks (v7x megacore). -----------
    tns = min(tns, _round_up(n, 8))
    if n >= 16 and _round_up(n, tns) // tns < 2:
        tns = _round_up(pl.cdiv(n, 2), 8)
    n_pad = _round_up(n, tns)

    # --- M layout: lane-dense (m_rows, 128); hazard weights precomputed. -------
    m_pad = _round_up(m, _LANE)
    m_rows = m_pad // _LANE

    hr = jnp.exp(refer_prediction[:, 0].astype(jnp.float32))            # (M,)
    hr_mat = jnp.pad(hr, (0, m_pad - m)).reshape(m_rows, _LANE)          # pad 0.0
    rt_mat = jnp.pad(refer_time.astype(jnp.float32), (0, m_pad - m),
                     constant_values=_NEG_BIG).reshape(m_rows, _LANE)

    # Pack [risk, E, time] along lanes; n lives on the sublane axis.
    pet = jnp.stack(
        [prediction[:, 0].astype(jnp.float32),
         targets[:, 0].astype(jnp.float32),
         time.astype(jnp.float32)],
        axis=1,
    )                                                                    # (N, 3)
    pet = jnp.pad(pet, ((0, n_pad - n), (0, 0)))

    grid = (n_pad // tns,)

    out = pl.pallas_call(
        functools.partial(_neg_log_lik_kernel, m_rows=m_rows),
        out_shape=jax.ShapeDtypeStruct((n_pad, 1), jnp.float32),
        grid_spec=pltpu.PrefetchScalarGridSpec(
            num_scalar_prefetch=0,
            grid=grid,
            in_specs=[
                pl.BlockSpec((tns, 3), lambda i: (i, 0)),          # [risk, E, time]
                pl.BlockSpec((m_rows, _LANE), lambda i: (0, 0)),   # exp(ref_pred), resident
                pl.BlockSpec((m_rows, _LANE), lambda i: (0, 0)),   # refer_time, resident
            ],
            out_specs=pl.BlockSpec((tns, 1), lambda i: (i, 0)),
        ),
        compiler_params=pltpu.CompilerParams(
            dimension_semantics=("parallel",),
        ),
        cost_estimate=pl.CostEstimate(
            flops=3 * m_pad * n_pad,           # compare + select + add per (m, n)
            transcendentals=2 * n_pad,         # exp(risk) + log per sample
            bytes_accessed=4 * (4 * n_pad + 2 * m_pad),  # reference read once
        ),
    )(pet, hr_mat, rt_mat)

    return out[:n, 0]


def _reference_jax(prediction, targets, time, refer_prediction, refer_time):
    risk = prediction.astype(jnp.float32)                       # (N, 1)
    e = targets.astype(jnp.float32)                             # (N, 1)
    hazard_ratio = jnp.exp(risk)                                # (N, 1)
    hazard_ratio_refer = jnp.exp(refer_prediction[:, 0])        # (M,)
    mat_all = (
        refer_time[:, None] - time[None, :] >= 0
    ).astype(jnp.float32)                                       # (M, N)
    hr_refer_sum = hazard_ratio_refer[None, :] @ mat_all        # (1, N)
    partial_sum = hazard_ratio + hr_refer_sum.T                 # (N, 1)
    uncensored = risk - jnp.log(partial_sum)
    censored = -uncensored * e
    return censored.sum(axis=1)


if __name__ == "__main__":
    key = jax.random.PRNGKey(0)
    keys = jax.random.split(key, 10)

    # Small shapes matching the module's forward signature.
    N, M, K = 8, 16, 4
    prediction = jax.random.normal(keys[0], (N, 1), dtype=jnp.float32)
    targets = (jax.random.uniform(keys[1], (N, 1)) > 0.5).astype(jnp.float32)
    time = jax.random.uniform(keys[2], (N,), dtype=jnp.float32) * 10.0
    refer_prediction = jax.random.normal(keys[3], (M, K), dtype=jnp.float32)
    refer_time = jax.random.uniform(keys[4], (M,), dtype=jnp.float32) * 10.0

    out = neg_log_likelihood_per_sample_for_splitting(
        prediction, targets, time, refer_prediction, refer_time
    )
    out = jax.block_until_ready(out)
    ref = _reference_jax(prediction, targets, time, refer_prediction, refer_time)
    assert out.shape == (N,)
    assert jnp.allclose(out, ref, rtol=1e-5, atol=1e-5), (out, ref)

    # Non-tile-aligned shapes to exercise padding / multi-chunk reduction /
    # multiple N blocks.
    N2, M2, K2 = 200, 333, 3
    prediction2 = jax.random.normal(keys[5], (N2, 1), dtype=jnp.float32)
    targets2 = (jax.random.uniform(keys[6], (N2, 1)) > 0.5).astype(jnp.float32)
    time2 = jax.random.uniform(keys[7], (N2,), dtype=jnp.float32) * 10.0
    refer_prediction2 = jax.random.normal(keys[8], (M2, K2), dtype=jnp.float32)
    refer_time2 = jax.random.uniform(keys[9], (M2,), dtype=jnp.float32) * 10.0

    out2 = neg_log_likelihood_per_sample_for_splitting(
        prediction2, targets2, time2, refer_prediction2, refer_time2
    )
    out2 = jax.block_until_ready(out2)
    ref2 = _reference_jax(prediction2, targets2, time2,
                          refer_prediction2, refer_time2)
    assert out2.shape == (N2,)
    assert jnp.allclose(out2, ref2, rtol=1e-4, atol=1e-4), (out2, ref2)

    print("KERNEL_OK")
</pallas_src>

<mosaic_0001>
module attributes {stable_mosaic.version = 11 : i64} {
  func.func @_neg_log_lik_kernel(%arg0: i32, %arg1: memref<8x3xf32, #tpu.memory_space<vmem>>, %arg2: memref<1x128xf32, #tpu.memory_space<vmem>>, %arg3: memref<1x128xf32, #tpu.memory_space<vmem>>, %arg4: memref<8x1xf32, #tpu.memory_space<vmem>>) attributes {dimension_semantics = [#tpu.dimension_semantics<parallel>], iteration_bounds = array<i64: 1>, scalar_prefetch = 0 : i64, scratch_operands = 0 : i64, tpu.core_type = #tpu.core_type<tc>, window_params = [{transform_indices = @transform_0, window_bounds = array<i64: 8, 3>}, {pipeline_mode = #tpu.pipeline_mode<synchronous>, transform_indices = @transform_1, window_bounds = array<i64: 1, 128>}, {pipeline_mode = #tpu.pipeline_mode<synchronous>, transform_indices = @transform_2, window_bounds = array<i64: 1, 128>}, {transform_indices = @transform_3, window_bounds = array<i64: 8, 1>}]} {
    %c0 = arith.constant 0 : index
    %c0_0 = arith.constant 0 : index
    %0 = vector.load %arg1[%c0, %c0_0] : memref<8x3xf32, #tpu.memory_space<vmem>>, vector<8x1xf32>
    %c0_1 = arith.constant 0 : index
    %c1 = arith.constant 1 : index
    %1 = vector.load %arg1[%c0_1, %c1] : memref<8x3xf32, #tpu.memory_space<vmem>>, vector<8x1xf32>
    %c0_2 = arith.constant 0 : index
    %c2 = arith.constant 2 : index
    %2 = vector.load %arg1[%c0_2, %c2] : memref<8x3xf32, #tpu.memory_space<vmem>>, vector<8x1xf32>
    %3 = vector.shape_cast %2 : vector<8x1xf32> to vector<8x1xf32>
    %4 = vector.broadcast %3 : vector<8x1xf32> to vector<8x128xf32>
    %cst = arith.constant 0.000000e+00 : f32
    %5 = vector.broadcast %cst : f32 to vector<8x128xf32>
    %c0_i32 = arith.constant 0 : i32
    %6 = arith.index_cast %c0_i32 : i32 to index
    %c0_3 = arith.constant 0 : index
    %7 = vector.load %arg3[%6, %c0_3] : memref<1x128xf32, #tpu.memory_space<vmem>>, vector<1x128xf32>
    %8 = arith.index_cast %c0_i32 : i32 to index
    %c0_4 = arith.constant 0 : index
    %9 = vector.load %arg2[%8, %c0_4] : memref<1x128xf32, #tpu.memory_space<vmem>>, vector<1x128xf32>
    %10 = vector.broadcast %7 : vector<1x128xf32> to vector<8x128xf32>
    %11 = arith.cmpf oge, %10, %4 : vector<8x128xf32>
    %cst_5 = arith.constant 0.000000e+00 : f32
    %12 = vector.shape_cast %9 : vector<1x128xf32> to vector<1x128xf32>
    %13 = vector.broadcast %12 : vector<1x128xf32> to vector<8x128xf32>
    %14 = vector.broadcast %cst_5 : f32 to vector<8x128xf32>
    %15 = arith.select %11, %13, %14 : vector<8x128xi1>, vector<8x128xf32>
    %16 = arith.addf %5, %15 : vector<8x128xf32>
    %c1_i32 = arith.constant 1 : i32
    %cst_6 = arith.constant dense<0.000000e+00> : vector<8xf32>
    %17 = vector.multi_reduction <add>, %16, %cst_6 [1] : vector<8x128xf32> to vector<8xf32>
    %18 = vector.shape_cast %17 : vector<8xf32> to vector<8x1xf32>
    %19 = math.exp %0 : vector<8x1xf32>
    %20 = arith.addf %19, %18 : vector<8x1xf32>
    %21 = math.log %20 : vector<8x1xf32>
    %22 = arith.subf %0, %21 : vector<8x1xf32>
    %cst_7 = arith.constant 0.000000e+00 : f32
    %23 = vector.broadcast %cst_7 : f32 to vector<8x1xf32>
    %24 = arith.subf %23, %22 : vector<8x1xf32>
    %25 = arith.mulf %24, %1 : vector<8x1xf32>
    %c0_8 = arith.constant 0 : index
    %c0_9 = arith.constant 0 : index
    %26 = vector.load %arg4[%c0_8, %c0_9] : memref<8x1xf32, #tpu.memory_space<vmem>>, vector<8x1xf32>
    tpu.vector_store %arg4[%c0_8, %c0_9], %25 {strides = array<i32>} : memref<8x1xf32, #tpu.memory_space<vmem>>, vector<8x1xf32>,
    return
  }
  func.func @transform_0(%arg0: i32) -> (i32, i32) {
    %c0_i32 = arith.constant 0 : i32
    %c0_i32_0 = arith.constant 0 : i32
    return %arg0, %c0_i32 : i32, i32
  }
  func.func @transform_1(%arg0: i32) -> (i32, i32) {
    %c0_i32 = arith.constant 0 : i32
    %c0_i32_0 = arith.constant 0 : i32
    %c0_i32_1 = arith.constant 0 : i32
    return %c0_i32, %c0_i32_0 : i32, i32
  }
  func.func @transform_2(%arg0: i32) -> (i32, i32) {
    %c0_i32 = arith.constant 0 : i32
    %c0_i32_0 = arith.constant 0 : i32
    %c0_i32_1 = arith.constant 0 : i32
    return %c0_i32, %c0_i32_0 : i32, i32
  }
  func.func @transform_3(%arg0: i32) -> (i32, i32) {
    %c0_i32 = arith.constant 0 : i32
    %c0_i32_0 = arith.constant 0 : i32
    return %arg0, %c0_i32 : i32, i32
  }
}

</mosaic_0001>

<bundles_post_ra>
// kernel: tpu_custom_call.1
= control target key start
LH: loop header
LB: loop body
LE: loop exit
PB: predicated region body
PF: predicated region fallthrough
CT: control target
= control target key end

     0   :  { %v65_v0 = vmov 2   ;;  %s66_s14 = smov 127   ;;  %vm50_vm1 = vcmask 7168   ;;  %s99_s0 = inlined_call_operand.vmem [shape: f32[8,3], index: 0, kind: input, shape index: {}]   ;;  %s100_s2 = inlined_call_operand.vmem [shape: f32[1,128], index: 2, kind: input, shape index: {}]   ;;  %s101_s1 = inlined_call_operand.vmem [shape: f32[1,128], index: 1, kind: input, shape index: {}]   ;;  %s102_s3 = inlined_call_operand.vmem [shape: f32[8,1], index: 3, kind: output, shape index: {}]  }
   0x1   :  { %60 = vset.pattern.permute.xlu0 %v65_v0  ;;  %v14_v1 = vld [vmem:[%s99_s0] sm:$0xff] }
   0x2   :  { %17 = vperm.xlu0 %60, %v14_v1   ;;  %46 = vrot.lane.b32.xlu1 %v14_v1, %s66_s14  ;;  %v56_v2 = vld [vmem:[%s100_s2] ss:$0 sm:$0xff]  ;;  %v39_v6 = vmul.f32 1.442695, %v14_v1 }
   0x3   :  { %v57_v3 = vld [vmem:[%s101_s1] ss:$0 sm:$0xff] }
   0x4   :  { %61 = vpow2.f32 %v39_v6 }
   0xe   :  { %v62_v7 = vpop.eup %61 }
  0x74   :  { %v47_v13 = vpop.permute.xlu1 %46 }
  0x81   :  { %v18_v4 = vpop.permute.xlu0 %17 }
  0x82   :  { %vm28_vm0 = vcmp.ge.f32.partialorder %v56_v2, %v18_v4 }
  0x83   :  { %v35_v5 = vsel %vm28_vm0, %v57_v3, 0.0 }
  0x84   :  { %37 = vadd.xlane.f32.xlu0 %v35_v5 }
 0x111   :  { %v38_v8 = vpop.xlane.xlu0 %37 }
 0x112   :  { %v41_v9 = vadd.f32 %v62_v7, %v38_v8 }
 0x114   :  { %63 = vlog2.f32 %v41_v9 }
 0x11e   :  { %v64_v10 = vpop.eup %63 }
 0x11f   :  { %v43_v11 = vmul.f32 0.6931472, %v64_v10 }
 0x121   :  { %v44_v12 = vsub.f32 %v14_v1, %v43_v11 }
 0x123   :  { %v45_v14 = vsub.f32 0.0, %v44_v12 }
 0x125   :  { %v49_v15 = vmul.f32 %v47_v13, %v45_v14 }
 0x127   :  { %51 = vst.msk [vmem:[%s102_s3] sm:$0xff] %vm50_vm1, %v49_v15 }

</bundles_post_ra>
